<compile_context>
chip_gen: v6e
topology: v6e:2x2x1
jax: 0.10.0
libtpu: 0.0.40
codegen_flags: <defaults>
</compile_context>

<pallas_src>
import jax
import jax.numpy as jnp
from jax.experimental import pallas as pl
from jax.experimental.pallas import tpu as pltpu

IN_DIM = 76
H_DIM = 220      # h_dim in the PyTorch module
OUT_DIM = 76

# Lane-aligned (padded) sizes used inside the kernel.
IN_PAD = 128
H_PAD = 256
OUT_PAD = 128


def _generator_kernel(z_ref,
                      w1, b1, w2, b2, w3, b3, w4, b4, w5, b5,
                      out_ref):
    """Fused 5-layer MLP forward for one batch tile.

    z_ref: (tile, IN_PAD) bf16.  Weights bf16, biases f32.  Output f32.
    All matmuls accumulate in f32 on the MXU; bias + ReLU in f32; activations
    are downcast to bf16 before the next dot.
    """
    def layer(a_bf16, w_ref, b_ref):
        acc = jnp.dot(a_bf16, w_ref[...], preferred_element_type=jnp.float32)
        return acc + b_ref[...]

    h = jnp.maximum(layer(z_ref[...], w1, b1), 0.0).astype(jnp.bfloat16)
    h = jnp.maximum(layer(h, w2, b2), 0.0).astype(jnp.bfloat16)
    h = jnp.maximum(layer(h, w3, b3), 0.0).astype(jnp.bfloat16)
    h = jnp.maximum(layer(h, w4, b4), 0.0).astype(jnp.bfloat16)
    out_ref[...] = layer(h, w5, b5).astype(out_ref.dtype)


def init_generator_params(key, dtype=jnp.float32):
    """Deterministic init mirroring PyTorch nn.Linear defaults
    (uniform(-1/sqrt(fan_in), +1/sqrt(fan_in)) for weight and bias).

    Weights are stored pre-transposed as (in_features, out_features);
    biases as (1, out_features).  Unpadded, f32.
    """
    dims = [(IN_DIM, H_DIM), (H_DIM, H_DIM), (H_DIM, H_DIM),
            (H_DIM, H_DIM), (H_DIM, OUT_DIM)]
    params = []
    for (fan_in, fan_out) in dims:
        key, kw, kb = jax.random.split(key, 3)
        bound = 1.0 / jnp.sqrt(jnp.float32(fan_in))
        w = jax.random.uniform(kw, (fan_in, fan_out), dtype=dtype,
                               minval=-bound, maxval=bound)
        b = jax.random.uniform(kb, (1, fan_out), dtype=dtype,
                               minval=-bound, maxval=bound)
        params.append((w, b))
    return params


def _pad2(a, rows, cols, dtype):
    """Zero-pad a 2-D array to (rows, cols) and cast."""
    out = jnp.zeros((rows, cols), dtype=dtype)
    return out.at[:a.shape[0], :a.shape[1]].set(a.astype(dtype))


def _pad_params(params):
    """Pad feature dims to 128/256; weights -> bf16, biases -> f32."""
    pad_dims = [(IN_PAD, H_PAD), (H_PAD, H_PAD), (H_PAD, H_PAD),
                (H_PAD, H_PAD), (H_PAD, OUT_PAD)]
    padded = []
    for (w, b), (pi, po) in zip(params, pad_dims):
        padded.append((_pad2(w, pi, po, jnp.bfloat16),
                       _pad2(b, 1, po, jnp.float32)))
    return padded


def _round_up(x, m):
    return -(-x // m) * m


def _choose_tile(batch, requested):
    """Pick a batch tile: multiple of 8, <= requested, and (when the batch is
    large enough) giving at least 2 grid steps so v7x megacore can shard."""
    b_pad = _round_up(batch, 8)
    tile = max(8, (min(requested, b_pad) // 8) * 8)
    if b_pad > 8 and b_pad // tile < 2:
        tile = max(8, ((b_pad // 2) // 8) * 8)
    b_pad = _round_up(b_pad, tile)
    return tile, b_pad


def generator_forward(z, params, *, batch_tile=512):
    """Run the fused Generator MLP Pallas kernel.

    z: (B, 76) float32 (any B).  params: output of init_generator_params.
    Returns (B, 76) float32.
    """
    B, F = z.shape
    assert F == IN_DIM

    tile, B_pad = _choose_tile(B, batch_tile)
    n_tiles = B_pad // tile

    # Pad batch + feature dims, cast activations to bf16 for the MXU.
    z_p = jnp.zeros((B_pad, IN_PAD), dtype=jnp.bfloat16)
    z_p = z_p.at[:B, :IN_DIM].set(z.astype(jnp.bfloat16))

    padded = _pad_params(params)
    flat_params = []
    for (w, b) in padded:
        flat_params.extend([w, b])

    # z / out are tiled over the batch; weights & biases use a constant
    # index_map so they are resident in VMEM across all grid steps.
    z_spec = pl.BlockSpec((tile, IN_PAD), lambda i: (i, 0))
    out_spec = pl.BlockSpec((tile, OUT_PAD), lambda i: (i, 0))
    param_specs = []
    for (w, b) in padded:
        param_specs.append(pl.BlockSpec(w.shape, lambda i: (0, 0)))
        param_specs.append(pl.BlockSpec(b.shape, lambda i: (0, 0)))

    fn = pl.pallas_call(
        _generator_kernel,
        out_shape=jax.ShapeDtypeStruct((B_pad, OUT_PAD), jnp.float32),
        grid_spec=pltpu.PrefetchScalarGridSpec(
            num_scalar_prefetch=0,
            grid=(n_tiles,),
            in_specs=[z_spec] + param_specs,
            out_specs=out_spec,
        ),
        compiler_params=pltpu.CompilerParams(
            dimension_semantics=("parallel",),
        ),
    )
    out_padded = fn(z_p, *flat_params)
    return out_padded[:B, :OUT_DIM]


def generator_reference(z, params, *, mimic_bf16=True):
    """Plain-JAX reference.  With mimic_bf16=True it rounds matmul inputs to
    bf16 (like the kernel) while accumulating in f32."""
    h = z.astype(jnp.float32)
    for i, (w, b) in enumerate(params):
        if mimic_bf16:
            a = h.astype(jnp.bfloat16).astype(jnp.float32)
            ww = w.astype(jnp.bfloat16).astype(jnp.float32)
        else:
            a, ww = h, w
        h = a @ ww + b.astype(jnp.float32)
        if i < len(params) - 1:
            h = jnp.maximum(h, 0.0)
    return h


if __name__ == "__main__":
    key = jax.random.PRNGKey(0)
    kp, kz = jax.random.split(key)

    params = init_generator_params(kp)

    B = 16   # small demo batch; kernel handles arbitrary B via padding
    z = jax.random.normal(kz, (B, IN_DIM), dtype=jnp.float32)

    out = generator_forward(z, params)
    out = jax.block_until_ready(out)

    ref = generator_reference(z, params, mimic_bf16=True)
    assert out.shape == (B, OUT_DIM)
    assert jnp.allclose(out, ref, atol=1e-2, rtol=1e-2), "mismatch vs reference"

    print("KERNEL_OK")
</pallas_src>

<mosaic_0001>
module attributes {stable_mosaic.version = 11 : i64} {
  func.func @_generator_kernel(%arg0: i32, %arg1: memref<8x128xbf16, #tpu.memory_space<vmem>>, %arg2: memref<128x256xbf16, #tpu.memory_space<vmem>>, %arg3: memref<1x256xf32, #tpu.memory_space<vmem>>, %arg4: memref<256x256xbf16, #tpu.memory_space<vmem>>, %arg5: memref<1x256xf32, #tpu.memory_space<vmem>>, %arg6: memref<256x256xbf16, #tpu.memory_space<vmem>>, %arg7: memref<1x256xf32, #tpu.memory_space<vmem>>, %arg8: memref<256x256xbf16, #tpu.memory_space<vmem>>, %arg9: memref<1x256xf32, #tpu.memory_space<vmem>>, %arg10: memref<256x128xbf16, #tpu.memory_space<vmem>>, %arg11: memref<1x128xf32, #tpu.memory_space<vmem>>, %arg12: memref<8x128xf32, #tpu.memory_space<vmem>>) attributes {dimension_semantics = [#tpu.dimension_semantics<parallel>], iteration_bounds = array<i64: 2>, scalar_prefetch = 0 : i64, scratch_operands = 0 : i64, tpu.core_type = #tpu.core_type<tc>, window_params = [{transform_indices = @transform_0, window_bounds = array<i64: 8, 128>}, {pipeline_mode = #tpu.pipeline_mode<synchronous>, transform_indices = @transform_1, window_bounds = array<i64: 128, 256>}, {pipeline_mode = #tpu.pipeline_mode<synchronous>, transform_indices = @transform_2, window_bounds = array<i64: 1, 256>}, {pipeline_mode = #tpu.pipeline_mode<synchronous>, transform_indices = @transform_3, window_bounds = array<i64: 256, 256>}, {pipeline_mode = #tpu.pipeline_mode<synchronous>, transform_indices = @transform_4, window_bounds = array<i64: 1, 256>}, {pipeline_mode = #tpu.pipeline_mode<synchronous>, transform_indices = @transform_5, window_bounds = array<i64: 256, 256>}, {pipeline_mode = #tpu.pipeline_mode<synchronous>, transform_indices = @transform_6, window_bounds = array<i64: 1, 256>}, {pipeline_mode = #tpu.pipeline_mode<synchronous>, transform_indices = @transform_7, window_bounds = array<i64: 256, 256>}, {pipeline_mode = #tpu.pipeline_mode<synchronous>, transform_indices = @transform_8, window_bounds = array<i64: 1, 256>}, {pipeline_mode = #tpu.pipeline_mode<synchronous>, transform_indices = @transform_9, window_bounds = array<i64: 256, 128>}, {pipeline_mode = #tpu.pipeline_mode<synchronous>, transform_indices = @transform_10, window_bounds = array<i64: 1, 128>}, {transform_indices = @transform_11, window_bounds = array<i64: 8, 128>}]} {
    %c0 = arith.constant 0 : index
    %c0_0 = arith.constant 0 : index
    %0 = vector.load %arg1[%c0, %c0_0] : memref<8x128xbf16, #tpu.memory_space<vmem>>, vector<8x128xbf16>
    %c0_1 = arith.constant 0 : index
    %c0_2 = arith.constant 0 : index
    %1 = vector.load %arg2[%c0_1, %c0_2] : memref<128x256xbf16, #tpu.memory_space<vmem>>, vector<128x256xbf16>
    %cst = arith.constant dense<0.000000e+00> : vector<8x256xf32>
    %2 = tpu.matmul %0, %1, %cst {dimension_numbers = #tpu.dot_dimension_numbers<[1], [0], [0], [1], [0, 0, 1, 1], [], []>} : vector<8x128xbf16>, vector<128x256xbf16>, vector<8x256xf32> -> vector<8x256xf32>
    %c0_3 = arith.constant 0 : index
    %c0_4 = arith.constant 0 : index
    %3 = vector.load %arg3[%c0_3, %c0_4] : memref<1x256xf32, #tpu.memory_space<vmem>>, vector<1x256xf32>
    %4 = vector.broadcast %3 : vector<1x256xf32> to vector<8x256xf32>
    %5 = arith.addf %2, %4 : vector<8x256xf32>
    %cst_5 = arith.constant 0.000000e+00 : f32
    %6 = vector.broadcast %cst_5 : f32 to vector<8x256xf32>
    %7 = arith.maximumf %5, %6 : vector<8x256xf32>
    %8 = arith.truncf %7 : vector<8x256xf32> to vector<8x256xbf16>
    %c0_6 = arith.constant 0 : index
    %c0_7 = arith.constant 0 : index
    %9 = vector.load %arg4[%c0_6, %c0_7] : memref<256x256xbf16, #tpu.memory_space<vmem>>, vector<256x256xbf16>
    %cst_8 = arith.constant dense<0.000000e+00> : vector<8x256xf32>
    %10 = tpu.matmul %8, %9, %cst_8 {dimension_numbers = #tpu.dot_dimension_numbers<[1], [0], [0], [1], [0, 0, 1, 1], [], []>} : vector<8x256xbf16>, vector<256x256xbf16>, vector<8x256xf32> -> vector<8x256xf32>
    %c0_9 = arith.constant 0 : index
    %c0_10 = arith.constant 0 : index
    %11 = vector.load %arg5[%c0_9, %c0_10] : memref<1x256xf32, #tpu.memory_space<vmem>>, vector<1x256xf32>
    %12 = vector.broadcast %11 : vector<1x256xf32> to vector<8x256xf32>
    %13 = arith.addf %10, %12 : vector<8x256xf32>
    %cst_11 = arith.constant 0.000000e+00 : f32
    %14 = vector.broadcast %cst_11 : f32 to vector<8x256xf32>
    %15 = arith.maximumf %13, %14 : vector<8x256xf32>
    %16 = arith.truncf %15 : vector<8x256xf32> to vector<8x256xbf16>
    %c0_12 = arith.constant 0 : index
    %c0_13 = arith.constant 0 : index
    %17 = vector.load %arg6[%c0_12, %c0_13] : memref<256x256xbf16, #tpu.memory_space<vmem>>, vector<256x256xbf16>
    %cst_14 = arith.constant dense<0.000000e+00> : vector<8x256xf32>
    %18 = tpu.matmul %16, %17, %cst_14 {dimension_numbers = #tpu.dot_dimension_numbers<[1], [0], [0], [1], [0, 0, 1, 1], [], []>} : vector<8x256xbf16>, vector<256x256xbf16>, vector<8x256xf32> -> vector<8x256xf32>
    %c0_15 = arith.constant 0 : index
    %c0_16 = arith.constant 0 : index
    %19 = vector.load %arg7[%c0_15, %c0_16] : memref<1x256xf32, #tpu.memory_space<vmem>>, vector<1x256xf32>
    %20 = vector.broadcast %19 : vector<1x256xf32> to vector<8x256xf32>
    %21 = arith.addf %18, %20 : vector<8x256xf32>
    %cst_17 = arith.constant 0.000000e+00 : f32
    %22 = vector.broadcast %cst_17 : f32 to vector<8x256xf32>
    %23 = arith.maximumf %21, %22 : vector<8x256xf32>
    %24 = arith.truncf %23 : vector<8x256xf32> to vector<8x256xbf16>
    %c0_18 = arith.constant 0 : index
    %c0_19 = arith.constant 0 : index
    %25 = vector.load %arg8[%c0_18, %c0_19] : memref<256x256xbf16, #tpu.memory_space<vmem>>, vector<256x256xbf16>
    %cst_20 = arith.constant dense<0.000000e+00> : vector<8x256xf32>
    %26 = tpu.matmul %24, %25, %cst_20 {dimension_numbers = #tpu.dot_dimension_numbers<[1], [0], [0], [1], [0, 0, 1, 1], [], []>} : vector<8x256xbf16>, vector<256x256xbf16>, vector<8x256xf32> -> vector<8x256xf32>
    %c0_21 = arith.constant 0 : index
    %c0_22 = arith.constant 0 : index
    %27 = vector.load %arg9[%c0_21, %c0_22] : memref<1x256xf32, #tpu.memory_space<vmem>>, vector<1x256xf32>
    %28 = vector.broadcast %27 : vector<1x256xf32> to vector<8x256xf32>
    %29 = arith.addf %26, %28 : vector<8x256xf32>
    %cst_23 = arith.constant 0.000000e+00 : f32
    %30 = vector.broadcast %cst_23 : f32 to vector<8x256xf32>
    %31 = arith.maximumf %29, %30 : vector<8x256xf32>
    %32 = arith.truncf %31 : vector<8x256xf32> to vector<8x256xbf16>
    %c0_24 = arith.constant 0 : index
    %c0_25 = arith.constant 0 : index
    %33 = vector.load %arg10[%c0_24, %c0_25] : memref<256x128xbf16, #tpu.memory_space<vmem>>, vector<256x128xbf16>
    %cst_26 = arith.constant dense<0.000000e+00> : vector<8x128xf32>
    %34 = tpu.matmul %32, %33, %cst_26 {dimension_numbers = #tpu.dot_dimension_numbers<[1], [0], [0], [1], [0, 0, 1, 1], [], []>} : vector<8x256xbf16>, vector<256x128xbf16>, vector<8x128xf32> -> vector<8x128xf32>
    %c0_27 = arith.constant 0 : index
    %c0_28 = arith.constant 0 : index
    %35 = vector.load %arg11[%c0_27, %c0_28] : memref<1x128xf32, #tpu.memory_space<vmem>>, vector<1x128xf32>
    %36 = vector.broadcast %35 : vector<1x128xf32> to vector<8x128xf32>
    %37 = arith.addf %34, %36 : vector<8x128xf32>
    %c0_29 = arith.constant 0 : index
    %c0_30 = arith.constant 0 : index
    %38 = vector.load %arg12[%c0_29, %c0_30] : memref<8x128xf32, #tpu.memory_space<vmem>>, vector<8x128xf32>
    tpu.vector_store %arg12[%c0_29, %c0_30], %37 {strides = array<i32>} : memref<8x128xf32, #tpu.memory_space<vmem>>, vector<8x128xf32>,
    return
  }
  func.func @transform_0(%arg0: i32) -> (i32, i32) {
    %c0_i32 = arith.constant 0 : i32
    %c0_i32_0 = arith.constant 0 : i32
    return %arg0, %c0_i32 : i32, i32
  }
  func.func @transform_1(%arg0: i32) -> (i32, i32) {
    %c0_i32 = arith.constant 0 : i32
    %c0_i32_0 = arith.constant 0 : i32
    %c0_i32_1 = arith.constant 0 : i32
    return %c0_i32, %c0_i32_0 : i32, i32
  }
  func.func @transform_2(%arg0: i32) -> (i32, i32) {
    %c0_i32 = arith.constant 0 : i32
    %c0_i32_0 = arith.constant 0 : i32
    %c0_i32_1 = arith.constant 0 : i32
    return %c0_i32, %c0_i32_0 : i32, i32
  }
  func.func @transform_3(%arg0: i32) -> (i32, i32) {
    %c0_i32 = arith.constant 0 : i32
    %c0_i32_0 = arith.constant 0 : i32
    %c0_i32_1 = arith.constant 0 : i32
    return %c0_i32, %c0_i32_0 : i32, i32
  }
  func.func @transform_4(%arg0: i32) -> (i32, i32) {
    %c0_i32 = arith.constant 0 : i32
    %c0_i32_0 = arith.constant 0 : i32
    %c0_i32_1 = arith.constant 0 : i32
    return %c0_i32, %c0_i32_0 : i32, i32
  }
  func.func @transform_5(%arg0: i32) -> (i32, i32) {
    %c0_i32 = arith.constant 0 : i32
    %c0_i32_0 = arith.constant 0 : i32
    %c0_i32_1 = arith.constant 0 : i32
    return %c0_i32, %c0_i32_0 : i32, i32
  }
  func.func @transform_6(%arg0: i32) -> (i32, i32) {
    %c0_i32 = arith.constant 0 : i32
    %c0_i32_0 = arith.constant 0 : i32
    %c0_i32_1 = arith.constant 0 : i32
    return %c0_i32, %c0_i32_0 : i32, i32
  }
  func.func @transform_7(%arg0: i32) -> (i32, i32) {
    %c0_i32 = arith.constant 0 : i32
    %c0_i32_0 = arith.constant 0 : i32
    %c0_i32_1 = arith.constant 0 : i32
    return %c0_i32, %c0_i32_0 : i32, i32
  }
  func.func @transform_8(%arg0: i32) -> (i32, i32) {
    %c0_i32 = arith.constant 0 : i32
    %c0_i32_0 = arith.constant 0 : i32
    %c0_i32_1 = arith.constant 0 : i32
    return %c0_i32, %c0_i32_0 : i32, i32
  }
  func.func @transform_9(%arg0: i32) -> (i32, i32) {
    %c0_i32 = arith.constant 0 : i32
    %c0_i32_0 = arith.constant 0 : i32
    %c0_i32_1 = arith.constant 0 : i32
    return %c0_i32, %c0_i32_0 : i32, i32
  }
  func.func @transform_10(%arg0: i32) -> (i32, i32) {
    %c0_i32 = arith.constant 0 : i32
    %c0_i32_0 = arith.constant 0 : i32
    %c0_i32_1 = arith.constant 0 : i32
    return %c0_i32, %c0_i32_0 : i32, i32
  }
  func.func @transform_11(%arg0: i32) -> (i32, i32) {
    %c0_i32 = arith.constant 0 : i32
    %c0_i32_0 = arith.constant 0 : i32
    return %arg0, %c0_i32 : i32, i32
  }
}

</mosaic_0001>

<bundles_post_ra>
// kernel: tpu_custom_call.1
= control target key start
LH: loop header
LB: loop body
LE: loop exit
PB: predicated region body
PF: predicated region fallthrough
CT: control target
= control target key end

     0   :  { %s2709_s0 = inlined_call_operand.hbm [shape: bf16[16,128], index: 0, kind: input, shape index: {}]   ;;  %s2710_s1 = inlined_call_operand.hbm [shape: bf16[128,256], index: 1, kind: input, shape index: {}]   ;;  %s2711_s2 = inlined_call_operand.vmem [shape: f32[1,256], index: 2, kind: input, shape index: {}]   ;;  %s2712_s3 = inlined_call_operand.hbm [shape: bf16[256,256], index: 3, kind: input, shape index: {}]   ;;  %s2713_s4 = inlined_call_operand.vmem [shape: f32[1,256], index: 4, kind: input, shape index: {}]   ;;  %s2714_s5 = inlined_call_operand.hbm [shape: bf16[256,256], index: 5, kind: input, shape index: {}]   ;;  %s2715_s6 = inlined_call_operand.vmem [shape: f32[1,256], index: 6, kind: input, shape index: {}]   ;;  %s2716_s7 = inlined_call_operand.hbm [shape: bf16[256,256], index: 7, kind: input, shape index: {}]   ;;  %s2717_s8 = inlined_call_operand.vmem [shape: f32[1,256], index: 8, kind: input, shape index: {}]   ;;  %s2718_s9 = inlined_call_operand.hbm [shape: bf16[256,128], index: 9, kind: input, shape index: {}]   ;;  %s2719_s10 = inlined_call_operand.vmem [shape: f32[1,128], index: 10, kind: input, shape index: {}]   ;;  %s2720_s11 = inlined_call_operand.hbm [shape: f32[16,128], index: 11, kind: output, shape index: {}]  }
   0x1   :  { %2725 = sst [smem:[#allocation20_spill]] %s2710_s1 }
   0x2   :  { %2726 = sst [smem:[#allocation21_spill]] %s2712_s3 }
   0x3   :  { %2727 = sst [smem:[#allocation22_spill]] %s2714_s5 }
   0x4   :  { %2728 = sst [smem:[#allocation23_spill]] %s2716_s7 }
   0x5   :  { %2729 = sst [smem:[#allocation24_spill]] %s2718_s9 }
   0x6   :  { %16 = vsyncpa [#allocation3], 0 }
   0x7   :  { %18 = vsyncpa [#allocation3 + $0x1], 0 }
   0x8   :  { %19 = vsyncpa [#allocation6], 0 }
   0x9   :  { %20 = vsyncpa [#allocation9], 0 }
   0xa   :  { %21 = vsyncpa [#allocation12], 0 }
   0xb   :  { %22 = vsyncpa [#allocation4], 0 }
   0xc   :  { %24 = vsyncpa [#allocation4 + $0x1], 0  ;;  %s2452_s17 = smov 0   ;;  %s2454_s18 = smov 0  }
   0xd   :  { %s2456_s19 = smov 0   ;;  %s2458_s20 = smov 0  }
   0xe LB: > { %s2380_s21 = smov [#allocation5]   ;;  %s2473_s23 = sadd.s32 4294967295, %s2378_s20   ;;  %s2378_s20 = sphi %s2458_s20, %s2758_s20   ;;  %s2374_s19 = sphi %s2456_s19, %s2757_s19   ;;  %s2370_s18 = sphi %s2454_s18, %s2756_s18   ;;  %s2366_s17 = sphi %s2452_s17, %s2755_s17  }
   0xf   : > { %s309_s22 = sshll.u32 %s2380_s21, 4  ;;  %p1686_p0 = scmp.ge.s32.totalorder %s2378_s20, 1  ;;  %s310_s22 = int_to_ptr.vmem [resolvable:$true] %s309_s22 }
  0x10   : > { %p2721_p1 = scmp.eq.s32.totalorder %s2473_s23, 0  ;;  %p297_p2 = scmp.lt.s32.totalorder %s2378_s20, 3 }
  0x11   : > { %s2381_s25 = smov [#allocation8]   ;;  %s2382_s28 = smov [#allocation7]  }
  0x12   : > { %p2478_p3 = pnand %p1686_p0, %p297_p2  ;;  %s341_s26 = sshll.u32 %s2381_s25, 4  ;;  %s2491_s26 = int_to_ptr.vmem [resolvable:$true] %s341_s26 }
  0x13   : > { %s325_s29 = sshll.u32 %s2382_s28, 4  ;;  %s2155_s12 = scalar_lea.vmem %s310_s22, 2048  ;;  %s2493_s29 = int_to_ptr.vmem [resolvable:$true] %s325_s29 }
  0x14   : > { %s2730_s24 = scalar_select %p2478_p3, 1, 0 }
  0x15   : > { %p1882_p5 = pneg %p2478_p3  ;;  %p2156_p8 = scmp.ne.s32.totalorder %s310_s22, %s2155_s12 }
  0x16   : > { %p2163_p11 = scmp.lt.s32.totalorder %s310_s22, %s310_s22  ;;  %p2164_p12 = scmp.lt.s32.totalorder %s2155_s12, %s2155_s12 }
  0x17   : > { %p2487_p6 = pnand %p1882_p5, %p2721_p1 }
  0x18   : > { %p2165_p13 = por %p2164_p12, %p2163_p11 }
  0x19   : > { %p2497_p7 = pneg %p2487_p6 }
  0x1b   : > { %p2158_p9 = pnand %p2156_p8, %p2497_p7 }
  0x1d   : > { %p2159_p10 = pneg %p2158_p9 }
  0x1f   : > { %p2166_p0 = pnand %p2165_p13, %p2159_p10 }
  0x21   : > { %2169 = shalt.err (!%p2166_p0)
}
  0x22   : > { %s2383_s13 = smov 128   ;;  %s2384_s14 = smov 8  }
  0x23   : > { %s2733_s1 = sld [smem:[#allocation20_spill]]  ;;  %s2181_s21 = scalar_lea.vmem %s2491_s26, 4096 }
  0x24   : > { %p2182_p2 = scmp.ne.s32.totalorder %s2491_s26, %s2181_s21  ;;  %p2189_p9 = scmp.lt.s32.totalorder %s2491_s26, %s2491_s26 }
  0x25   : > { %p2190_p10 = scmp.lt.s32.totalorder %s2181_s21, %s2181_s21 }
  0x26   : > { %p2184_p5 = pnand %p2182_p2, %p2497_p7 }
  0x27   : > { %p2191_p11 = por %p2190_p10, %p2189_p9 }
  0x28   : > { %p2185_p8 = pneg %p2184_p5 }
  0x29   : > { %1885 = dma.hbm_to_vmem [thread:$0]  (!%p2487_p6), %s2733_s1, 2048, %s310_s22, [#allocation6], %s2383_s13, %s2383_s13, %s2384_s14  }
  0x2a   : > { %p2192_p12 = pnand %p2191_p11, %p2185_p8 }
  0x2c   : > { %2195 = shalt.err (!%p2192_p12)
}
  0x2d   : > { %s2734_s5 = sld [smem:[#allocation22_spill]]  ;;  %s2207_s22 = scalar_lea.vmem %s2493_s29, 4096 }
  0x2e   : > { %p2208_p13 = scmp.ne.s32.totalorder %s2493_s29, %s2207_s22  ;;  %p2215_p5 = scmp.lt.s32.totalorder %s2493_s29, %s2493_s29 }
  0x2f   : > { %p2216_p8 = scmp.lt.s32.totalorder %s2207_s22, %s2207_s22 }
  0x30   : > { %p2210_p0 = pnand %p2208_p13, %p2497_p7 }
  0x31   : > { %p2217_p9 = por %p2216_p8, %p2215_p5 }
  0x32   : > { %p2211_p2 = pneg %p2210_p0 }
  0x33   : > { %1891 = dma.hbm_to_vmem [thread:$0]  (!%p2487_p6), %s2734_s5, 4096, %s2491_s26, [#allocation9], %s2383_s13, %s2383_s13, %s2384_s14  }
  0x34   : > { %p2218_p10 = pnand %p2217_p9, %p2211_p2 }
  0x36   : > { %2221 = shalt.err (!%p2218_p10)
}
  0x37   : > { %s2735_s3 = sld [smem:[#allocation21_spill]]  ;;  %s2385_s26 = smov [#allocation10]  }
  0x38   : > { %s357_s16 = sshll.u32 %s2385_s26, 4  ;;  %s2386_s21 = smov [#allocation11]   ;;  %s358_s16 = int_to_ptr.vmem [resolvable:$true] %s357_s16 }
  0x39   : > { %s373_s25 = sshll.u32 %s2386_s21, 4  ;;  %s2233_s28 = scalar_lea.vmem %s358_s16, 4096  ;;  %s374_s25 = int_to_ptr.vmem [resolvable:$true] %s373_s25 }
  0x3a   : > { %p2234_p11 = scmp.ne.s32.totalorder %s358_s16, %s2233_s28  ;;  %p2241_p0 = scmp.lt.s32.totalorder %s358_s16, %s358_s16 }
  0x3b   : > { %p2242_p2 = scmp.lt.s32.totalorder %s2233_s28, %s2233_s28 }
  0x3c   : > { %p2236_p12 = pnand %p2234_p11, %p2497_p7 }
  0x3d   : > { %1888 = dma.hbm_to_vmem [thread:$0]  (!%p2487_p6), %s2735_s3, 4096, %s2493_s29, [#allocation6], %s2383_s13, %s2383_s13, %s2384_s14  }
  0x3e   : > { %p2237_p13 = pneg %p2236_p12  ;;  %p2243_p5 = por %p2242_p2, %p2241_p0 }
  0x40   : > { %p2244_p8 = pnand %p2243_p5, %p2237_p13 }
  0x42   : > { %2247 = shalt.err (!%p2244_p8)
}
  0x43   : > { %s2736_s7 = sld [smem:[#allocation23_spill]]  ;;  %s2259_s12 = scalar_lea.vmem %s374_s25, 2048 }
  0x44   : > { %p2260_p9 = scmp.ne.s32.totalorder %s374_s25, %s2259_s12  ;;  %p2267_p12 = scmp.lt.s32.totalorder %s374_s25, %s374_s25 }
  0x45   : > { %p2268_p0 = scmp.lt.s32.totalorder %s2259_s12, %s2259_s12 }
  0x46   : > { %p2262_p10 = pnand %p2260_p9, %p2497_p7 }
  0x47   : > { %p2269_p13 = por %p2268_p0, %p2267_p12 }
  0x48   : > { %p2263_p11 = pneg %p2262_p10 }
  0x49   : > { %1894 = dma.hbm_to_vmem [thread:$0]  (!%p2487_p6), %s2736_s7, 4096, %s358_s16, [#allocation9], %s2383_s13, %s2383_s13, %s2384_s14  }
  0x4a   : > { %p2270_p2 = pnand %p2269_p13, %p2263_p11 }
  0x4c   : > { %2273 = shalt.err (!%p2270_p2)
}
  0x4d   : > { %s2387_s15 = smov 64   ;;  %s2388_s30 = smov 4  }
  0x4e   : > { %s2737_s9 = sld [smem:[#allocation24_spill]]  ;;  %s1685_s26 = sadd.s32 4294967294, %s2378_s20  }
  0x4f   : > { %s2560_s16 = sadd.s32 1, %s2378_s20   ;;  %s37_s21 = sadd.s32 1, %s2374_s19 }
  0x50   : > { %s34_s28 = ssub.s32 %s2378_s20, %s2560_s16  ;;  %p44_p7 = scmp.ne.s32.totalorder %s2374_s19, %s2370_s18 }
  0x51   : > { %p35_p5 = scmp.eq.s32.totalorder %s34_s28, 0  ;;  %p45_p8 = scmp.eq.s32.totalorder %s2378_s20, 0 }
  0x52   : > { %p50_p9 = scmp.ne.s32.totalorder %s2370_s18, %s2366_s17  ;;  %p284_p10 = scmp.eq.s32.totalorder %s2473_s23, 1 }
  0x53   : > { %s2572_s29 = scalar_select %p35_p5, %s2374_s19, %s37_s21  }
  0x54   : > { %1897 = dma.hbm_to_vmem [thread:$0]  (!%p2487_p6), %s2737_s9, 2048, %s374_s25, [#allocation12], %s2387_s15, %s2387_s15, %s2388_s30  }
  0x55   : > { %2738 = sst [smem:[#allocation19_spill]] %s2572_s29  ;;  %p46_p11 = por %p45_p8, %p44_p7 }
  0x56   : > { %p2576_p12 = por %p2721_p1, %p50_p9  ;;  %p2580_p6 = por %p284_p10, %p44_p7 }
  0x57   : > { %p290_p0 = scmp.eq.s32.totalorder %s1685_s26, 1  ;;  %p1911_p13 = scmp.lt.s32.totalorder %s2378_s20, 2 }
  0x58   : > { %s2739_s27 = scalar_select %p2576_p12, 1, 0 }
  0x59   : > { %s2740_s25 = scalar_select %p2580_p6, 1, 0 }
  0x5a   : > { %s390_s22 = sand.u32 1, %s2374_s19   ;;  %p2586_p2 = por %p290_p0, %p50_p9 }
  0x5b   : > { %s1693_s15 = sshll.u32 %s390_s22, 2  ;;  %s1694_s30 = sshll.u32 %s2378_s20, 6 }
  0x5c   : > { %s2741_s12 = scalar_select %p2586_p2, 1, 0 }
  0x5d   : > { %s2594_s21 = scalar_lea.hbm %s2709_s0, %s1694_s30  ;;  %s394_s28 = scalar_lea.vmem [#allocation2], %s1693_s15 }
  0x5e   : > { %s401_s1 = sshll.u32 %s394_s28, 4  ;;  %p2596_p7 = pnand %p1911_p13, %p46_p11  ;;  %s402_s1 = int_to_ptr.vmem [resolvable:$true] %s401_s1 }
  0x5f   : > { %s391_s3 = scalar_lea.sflag [#allocation3], %s390_s22  ;;  %s2274_s5 = scalar_lea.hbm %s2594_s21, 64 }
  0x60   : > { %p2275_p5 = scmp.ne.s32.totalorder %s2594_s21, %s2274_s5  ;;  %p2276_p8 = pneg %p2596_p7 }
  0x61   : > { %s2279_s14 = scalar_lea.hbm %s2709_s0, 128  ;;  %p2280_p11 = scmp.lt.s32.totalorder %s2594_s21, %s2709_s0 }
  0x62   : > { %p2277_p9 = pnand %p2276_p8, %p2275_p5  ;;  %p2281_p0 = scmp.lt.s32.totalorder %s2279_s14, %s2274_s5 }
  0x64   : > { %p2278_p10 = pneg %p2277_p9  ;;  %p2282_p13 = por %p2281_p0, %p2280_p11 }
  0x66   : > { %p2283_p4 = pnand %p2282_p13, %p2278_p10 }
  0x68   : > { %2286 = shalt.err (!%p2283_p4)
}
  0x69   : > { %s2287_s28 = scalar_lea.vmem %s402_s1, 64  ;;  %s2389_s22 = smov [#allocation2]  }
  0x6a   : > { %p2288_p1 = scmp.ne.s32.totalorder %s402_s1, %s2287_s28  ;;  %s2292_s9 = sshll.u32 %s2389_s22, 4  ;;  %s2293_s9 = int_to_ptr.vmem [resolvable:$false] %s2292_s9 }
  0x6b   : > { %s2294_s29 = scalar_lea.vmem %s2293_s9, 128  ;;  %p2295_p5 = scmp.lt.s32.totalorder %s402_s1, %s2293_s9 }
  0x6c   : > { %p2290_p2 = pnand %p2288_p1, %p2276_p8  ;;  %p2296_p9 = scmp.lt.s32.totalorder %s2294_s29, %s2287_s28 }
  0x6e   : > { %p2291_p6 = pneg %p2290_p2  ;;  %p2297_p12 = por %p2296_p9, %p2295_p5 }
  0x70   : > { %p2298_p3 = pnand %p2297_p12, %p2291_p6 }
  0x72   : > { %2301 = shalt.err (!%p2298_p3)
}
  0x73   : > { %1901 = dma.hbm_to_vmem [thread:$0]  (!%p2596_p7), %s2594_s21, 64, %s402_s1, %s391_s3  }
  0x74   : > { %p2743_p10 = scmp.ne.s32.totalorder %s2730_s24, 0 }
  0x75   : > { %s2617_s5 = sand.u32 (!%p2743_p10), 1, %s2370_s18   ;;  %p2744_p1 = scmp.ne.s32.totalorder (!%p2743_p10), %s2739_s27, 0 }
  0x76   : > { %410 = sbr.rel (%p2743_p10) target bundleno = 1186 (0x4a2), region = 64  ;;  %s1696_s7 = sshll.u32 (!%p2743_p10), %s2617_s5, 2 }
  0x77   : > { %s413_s30 = scalar_lea.sflag (!%p2743_p10), [#allocation3], %s2617_s5  ;;  %s2621_s9 = scalar_lea.vmem (!%p2743_p10), [#allocation2], %s1696_s7 }
  0x7b   : > { %2345 = dma.done.wait (%p2744_p1), %s413_s30, 64  }
  0x7c   : > { %2347 = vsyncadd (%p2744_p1), %s413_s30, 4294967232  ;;  %p2745_p3 = scmp.eq.s32.totalorder %s2473_s23, 0 }
  0x7e   : > { %2349 = dma.done.wait (%p2745_p3), [#allocation6], 6144   ;;  %p2746_p4 = pmov %p2745_p3 }
  0x7f   : > { %p2747_p12 = pmov %p2745_p3 }
  0x80   : > { %2351 = vsyncadd (%p2746_p4), [#allocation6], 4294961152 }
  0x81   : > { %2353 = dma.done.wait (%p2747_p12), [#allocation9], 8192   ;;  %p2748_p6 = pmov %p2745_p3 }
  0x82   : > { %p2749_p2 = pmov %p2745_p3 }
  0x83   : > { %2355 = vsyncadd (%p2748_p6), [#allocation9], 4294959104 }
  0x84   : > { %2357 = dma.done.wait (%p2749_p2), [#allocation12], 2048   ;;  %p2750_p7 = pmov %p2749_p2 }
  0x85   : > { %v2390_v0 = vmov 0   ;;  %v1960_v1 = vld [vmem:[#allocation5 + $0x74] ss:$8 sps:$4 sm:$0xff]   ;;  %v1962_v2 = vld [vmem:[#allocation5 + $0x70] ss:$8 sps:$4 sm:$0xff]   ;;  %s1702_s14 = sshll.u32 %s2617_s5, 3 }
  0x86   : > { %2359 = vsyncadd (%p2750_p7), [#allocation12], 4294965248  ;;  %617 = vmatprep.mubr.bf16.mxu0 %v2390_v0  ;;  %585 = vmatprep.subr.bf16.mxu0 %v1960_v1  ;;  %v1963_v3 = vld [vmem:[#allocation5 + $0x64] ss:$8 sps:$4 sm:$0xff]   ;;  %v1965_v4 = vld [vmem:[#allocation5 + $0x60] ss:$8 sps:$4 sm:$0xff]  }
  0x87   : > { %586 = vmatpush1.bf16.msra.mxu0 %v1962_v2  ;;  %v1966_v5 = vld [vmem:[#allocation5 + $0x54] ss:$8 sps:$4 sm:$0xff]   ;;  %v1968_v6 = vld [vmem:[#allocation5 + $0x50] ss:$8 sps:$4 sm:$0xff]   ;;  %v1969_v7 = vld [vmem:[#allocation5 + $0x44] ss:$8 sps:$4 sm:$0xff]  }
  0x88   : > { %587 = vmatprep.subr.bf16.mxu0 %v1963_v3  ;;  %v1971_v8 = vld [vmem:[#allocation5 + $0x40] ss:$8 sps:$4 sm:$0xff]   ;;  %v1972_v9 = vld [vmem:[#allocation5 + $0x34] ss:$8 sps:$4 sm:$0xff]   ;;  %v1986_v11 = vld [vmem:[#allocation7 + $0x70] ss:$8 sps:$4 sm:$0xff]  }
  0x89   : > { %v1984_v10 = vld [vmem:[#allocation7 + $0x74] ss:$8 sps:$4 sm:$0xff]   ;;  %v1987_v12 = vld [vmem:[#allocation7 + $0x64] ss:$8 sps:$4 sm:$0xff]   ;;  %v1974_v13 = vld [vmem:[#allocation5 + $0x30] ss:$8 sps:$4 sm:$0xff]  }
  0x8a   : > { %834 = vmatprep.subr.bf16.mxu1 %v1984_v10  ;;  %v1989_v14 = vld [vmem:[#allocation7 + $0x60] ss:$8 sps:$4 sm:$0xff]   ;;  %v1990_v15 = vld [vmem:[#allocation7 + $0x54] ss:$8 sps:$4 sm:$0xff]   ;;  %v1975_v16 = vld [vmem:[#allocation5 + $0x24] ss:$8 sps:$4 sm:$0xff]  }
  0x8b   : > { %588 = vmatpush1.bf16.msra.mxu0 %v1965_v4  ;;  %835 = vmatpush1.bf16.msra.mxu1 %v1986_v11  ;;  %v1977_v17 = vld [vmem:[#allocation5 + $0x20] ss:$8 sps:$4 sm:$0xff]   ;;  %v1992_v18 = vld [vmem:[#allocation7 + $0x50] ss:$8 sps:$4 sm:$0xff]   ;;  %v1993_v19 = vld [vmem:[#allocation7 + $0x44] ss:$8 sps:$4 sm:$0xff]  }
  0x8c   : > { %589 = vmatprep.subr.bf16.mxu0 %v1966_v5  ;;  %836 = vmatprep.subr.bf16.mxu1 %v1987_v12  ;;  %v1978_v20 = vld [vmem:[#allocation5 + $0x14] ss:$8 sps:$4 sm:$0xff]   ;;  %v1980_v21 = vld [vmem:[#allocation5 + $0x10] ss:$8 sps:$4 sm:$0xff]   ;;  %v1995_v22 = vld [vmem:[#allocation7 + $0x40] ss:$8 sps:$4 sm:$0xff]  }
  0x8d   : > { %v1996_v23 = vld [vmem:[#allocation7 + $0x34] ss:$8 sps:$4 sm:$0xff]   ;;  %v1981_v24 = vld [vmem:[#allocation5 + $0x4] ss:$8 sps:$4 sm:$0xff]   ;;  %v1983_v25 = vld [vmem:[#allocation5] ss:$8 sps:$4 sm:$0xff]  }
  0x8e   : > { %v1998_v26 = vld [vmem:[#allocation7 + $0x30] ss:$8 sps:$4 sm:$0xff]   ;;  %v1999_v27 = vld [vmem:[#allocation7 + $0x24] ss:$8 sps:$4 sm:$0xff]   ;;  %v2001_v29 = vld [vmem:[#allocation7 + $0x20] ss:$8 sps:$4 sm:$0xff]  }
  0x8f   : > { %590 = vmatpush1.bf16.msra.mxu0 %v1968_v6  ;;  %837 = vmatpush1.bf16.msra.mxu1 %v1989_v14  ;;  %v476_v28 = vld [vmem:[%s2621_s9] sm:$0xf]  ;;  %v2005_v32 = vld [vmem:[#allocation7 + $0x4] ss:$8 sps:$4 sm:$0xff]   ;;  %v2007_v33 = vld [vmem:[#allocation7] ss:$8 sps:$4 sm:$0xff]   ;;  %v495_v14 = vlaneseq }
  0x90   : > { %591 = vmatprep.subr.bf16.mxu0 %v1969_v7  ;;  %838 = vmatprep.subr.bf16.mxu1 %v1990_v15  ;;  %v2002_v30 = vld [vmem:[#allocation7 + $0x14] ss:$8 sps:$4 sm:$0xff]   ;;  %v2004_v31 = vld [vmem:[#allocation7 + $0x10] ss:$8 sps:$4 sm:$0xff]   ;;  %v2011_v36 = vld [vmem:[#allocation7 + $0xe4] ss:$8 sps:$4 sm:$0xff]  }
  0x91   : > { %v2008_v34 = vld [vmem:[#allocation7 + $0xf4] ss:$8 sps:$4 sm:$0xff]   ;;  %v2010_v35 = vld [vmem:[#allocation7 + $0xf0] ss:$8 sps:$4 sm:$0xff]   ;;  %v2013_v37 = vld [vmem:[#allocation7 + $0xe0] ss:$8 sps:$4 sm:$0xff]  }
  0x92   : > { %v2014_v38 = vld [vmem:[#allocation7 + $0xd4] ss:$8 sps:$4 sm:$0xff]   ;;  %v2016_v39 = vld [vmem:[#allocation7 + $0xd0] ss:$8 sps:$4 sm:$0xff]   ;;  %v2017_v40 = vld [vmem:[#allocation7 + $0xc4] ss:$8 sps:$4 sm:$0xff]  }
  0x93   : > { %592 = vmatpush1.bf16.msra.mxu0 %v1971_v8  ;;  %839 = vmatpush1.bf16.msra.mxu1 %v1992_v18  ;;  %v2019_v41 = vld [vmem:[#allocation7 + $0xc0] ss:$8 sps:$4 sm:$0xff]   ;;  %v2020_v42 = vld [vmem:[#allocation7 + $0xb4] ss:$8 sps:$4 sm:$0xff]   ;;  %v2022_v43 = vld [vmem:[#allocation7 + $0xb0] ss:$8 sps:$4 sm:$0xff]  }
  0x94   : > { %593 = vmatprep.subr.bf16.mxu0 %v1972_v9  ;;  %840 = vmatprep.subr.bf16.mxu1 %v1993_v19  ;;  %v2023_v44 = vld [vmem:[#allocation7 + $0xa4] ss:$8 sps:$4 sm:$0xff]   ;;  %v2025_v45 = vld [vmem:[#allocation7 + $0xa0] ss:$8 sps:$4 sm:$0xff]   ;;  %v2026_v46 = vld [vmem:[#allocation7 + $0x94] ss:$8 sps:$4 sm:$0xff]  }
  0x95   : > { %v2028_v47 = vld [vmem:[#allocation7 + $0x90] ss:$8 sps:$4 sm:$0xff]   ;;  %v2029_v48 = vld [vmem:[#allocation7 + $0x84] ss:$8 sps:$4 sm:$0xff]   ;;  %v2031_v49 = vld [vmem:[#allocation7 + $0x80] ss:$8 sps:$4 sm:$0xff]  }
  0x96   : > { %v2032_v50 = vld [vmem:[#allocation8 + $0x70] ss:$8 sps:$4 sm:$0xff]   ;;  %v2034_v51 = vld [vmem:[#allocation8 + $0x74] ss:$8 sps:$4 sm:$0xff]   ;;  %v2037_v52 = vld [vmem:[#allocation8 + $0x64] ss:$8 sps:$4 sm:$0xff]  }
  0x97   : > { %594 = vmatpush1.bf16.msra.mxu0 %v1974_v13  ;;  %841 = vmatpush1.bf16.msra.mxu1 %v1995_v22  ;;  %v2035_v53 = vld [vmem:[#allocation8 + $0x60] ss:$8 sps:$4 sm:$0xff]   ;;  %v2040_v54 = vld [vmem:[#allocation8 + $0x54] ss:$8 sps:$4 sm:$0xff]   ;;  %v2038_v55 = vld [vmem:[#allocation8 + $0x50] ss:$8 sps:$4 sm:$0xff]  }
  0x98   : > { %595 = vmatprep.subr.bf16.mxu0 %v1975_v16  ;;  %842 = vmatprep.subr.bf16.mxu1 %v1996_v23  ;;  %v2043_v56 = vld [vmem:[#allocation8 + $0x44] ss:$8 sps:$4 sm:$0xff]   ;;  %v2041_v57 = vld [vmem:[#allocation8 + $0x40] ss:$8 sps:$4 sm:$0xff]   ;;  %v2046_v58 = vld [vmem:[#allocation8 + $0x34] ss:$8 sps:$4 sm:$0xff]  }
  0x99   : > { %v2044_v59 = vld [vmem:[#allocation8 + $0x30] ss:$8 sps:$4 sm:$0xff]   ;;  %v2049_v60 = vld [vmem:[#allocation8 + $0x24] ss:$8 sps:$4 sm:$0xff]   ;;  %v2047_v61 = vld [vmem:[#allocation8 + $0x20] ss:$8 sps:$4 sm:$0xff]  }
  0x9a   : > { %v2052_v62 = vld [vmem:[#allocation8 + $0x14] ss:$8 sps:$4 sm:$0xff]   ;;  %v2050_v63 = vld [vmem:[#allocation8 + $0x10] ss:$8 sps:$4 sm:$0xff]   ;;  %v2055_v0 = vld [vmem:[#allocation8 + $0x4] ss:$8 sps:$4 sm:$0xff]  }
  0x9b   : > { %596 = vmatpush1.bf16.msra.mxu0 %v1977_v17  ;;  %843 = vmatpush1.bf16.msra.mxu1 %v1998_v26  ;;  %v2053_v1 = vld [vmem:[#allocation8] ss:$8 sps:$4 sm:$0xff]   ;;  %v2058_v2 = vld [vmem:[#allocation8 + $0xf4] ss:$8 sps:$4 sm:$0xff]   ;;  %v2056_v3 = vld [vmem:[#allocation8 + $0xf0] ss:$8 sps:$4 sm:$0xff]  }
  0x9c   : > { %597 = vmatprep.subr.bf16.mxu0 %v1978_v20  ;;  %844 = vmatprep.subr.bf16.mxu1 %v1999_v27  ;;  %v2061_v4 = vld [vmem:[#allocation8 + $0xe4] ss:$8 sps:$4 sm:$0xff]   ;;  %v2059_v5 = vld [vmem:[#allocation8 + $0xe0] ss:$8 sps:$4 sm:$0xff]   ;;  %v2064_v6 = vld [vmem:[#allocation8 + $0xd4] ss:$8 sps:$4 sm:$0xff]  }
  0x9d   : > { %v2062_v7 = vld [vmem:[#allocation8 + $0xd0] ss:$8 sps:$4 sm:$0xff]   ;;  %v2067_v8 = vld [vmem:[#allocation8 + $0xc4] ss:$8 sps:$4 sm:$0xff]   ;;  %v2065_v9 = vld [vmem:[#allocation8 + $0xc0] ss:$8 sps:$4 sm:$0xff]  }
  0x9e   : > { %v2070_v10 = vld [vmem:[#allocation8 + $0xb4] ss:$8 sps:$4 sm:$0xff]   ;;  %v2068_v11 = vld [vmem:[#allocation8 + $0xb0] ss:$8 sps:$4 sm:$0xff]   ;;  %v2073_v12 = vld [vmem:[#allocation8 + $0xa4] ss:$8 sps:$4 sm:$0xff]  }
  0x9f   : > { %598 = vmatpush1.bf16.msra.mxu0 %v1980_v21  ;;  %845 = vmatpush1.bf16.msra.mxu1 %v2001_v29  ;;  %v2071_v13 = vld [vmem:[#allocation8 + $0xa0] ss:$8 sps:$4 sm:$0xff]   ;;  %v496_v15 = vshrl.u32 %v495_v14, 7  ;;  %v493_v17 = vld [vmem:[%s2711_s2] sm:$0x3]  ;;  %s1833_s22 = sshll.u32 %s2473_s23, 7 }
  0xa0   : > { %599 = vmatprep.subr.bf16.mxu0 %v1981_v24  ;;  %846 = vmatprep.subr.bf16.mxu1 %v2002_v30  ;;  %v2127_v14 = vld [vmem:[#allocation10 + $0x84] ss:$8 sps:$4 sm:$0xff]   ;;  %s474_s7 = scalar_lea.vmem [#allocation13], %s1702_s14  ;;  %s2672_s3 = scalar_lea.hbm %s2720_s11, %s1833_s22 }
  0xa1   : > { %v2640_v16 = vsub.s32 0, %v496_v15  ;;  %v2645_v18 = vsub.s32 1, %v496_v15  ;;  %v2125_v15 = vld [vmem:[#allocation10 + $0x80] ss:$8 sps:$4 sm:$0xff]   ;;  %s1567_s30 = sshll.u32 %s474_s7, 4  ;;  %s1554_s24 = scalar_lea.sflag [#allocation4], %s2617_s5  ;;  %s1568_s30 = int_to_ptr.vmem [resolvable:$true] %s1567_s30 }
  0xa2   : > { %s2302_s29 = scalar_lea.vmem %s1568_s30, 128  ;;  %p2751_p11 = scmp.ne.s32.totalorder %s2740_s25, 0 }
  0xa3   : > { %600 = vmatpush1.bf16.msra.mxu0 %v1983_v25  ;;  %847 = vmatpush1.bf16.msra.mxu1 %v2004_v31  ;;  %v498_v19 = vrot.slane %v493_v17, %v2640_v16  ;;  %v502_v20 = vrot.slane %v493_v17, %v2645_v18  ;;  %v2076_v31 = vld [vmem:[#allocation8 + $0x94] ss:$8 sps:$4 sm:$0xff]   ;;  %p2303_p8 = scmp.ne.s32.totalorder %s1568_s30, %s2302_s29  ;;  %s2391_s23 = smov [#allocation13]  }
  0xa4   : > { %848 = vmatprep.subr.bf16.mxu1 %v2005_v32  ;;  %1083 = vmatprep.subr.bf16.mxu0 %v2034_v51  ;;  %v2074_v32 = vld [vmem:[#allocation8 + $0x90] ss:$8 sps:$4 sm:$0xff]   ;;  %v2106_v51 = vld [vmem:[#allocation10 + $0xf4] ss:$8 sps:$4 sm:$0xff]   ;;  %s2306_s27 = sshll.u32 %s2391_s23, 4  ;;  %s2307_s27 = int_to_ptr.vmem [resolvable:$false] %s2306_s27 }
  0xa5   : > { %v2128_v17 = vld [vmem:[#allocation11 + $0x78] sm:$0xff]   ;;  %p2304_p0 = pnand %p2303_p8, %p2751_p11  ;;  %s2308_s21 = scalar_lea.vmem %s2307_s27, 256 }
  0xa6   : > { %618 = vmatmul.mubr.bf16.vlgmr.msra.gmra.mxu0 %v476_v28  ;;  %p2309_p5 = scmp.lt.s32.totalorder %s1568_s30, %s2307_s27  ;;  %p2310_p9 = scmp.lt.s32.totalorder %s2308_s21, %s2302_s29 }
  0xa7   : > { %849 = vmatpush1.bf16.msra.mxu1 %v2007_v33  ;;  %1084 = vmatpush1.bf16.msra.mxu0 %v2032_v50  ;;  %v2079_v33 = vld [vmem:[#allocation8 + $0x84] ss:$8 sps:$4 sm:$0xff]   ;;  %v2101_v50 = vld [vmem:[#allocation10] ss:$8 sps:$4 sm:$0xff]   ;;  %p2305_p13 = pneg %p2304_p0 }
  0xa8   : > { %850 = vmatprep.subr.bf16.mxu1 %v2008_v34  ;;  %1085 = vmatprep.subr.bf16.mxu0 %v2037_v52  ;;  %v2077_v34 = vld [vmem:[#allocation8 + $0x80] ss:$8 sps:$4 sm:$0xff]   ;;  %v2104_v52 = vld [vmem:[#allocation10 + $0xf0] ss:$8 sps:$4 sm:$0xff]   ;;  %p2311_p10 = por %p2310_p9, %p2309_p5 }
  0xaa   : > { %p2312_p1 = pnand %p2311_p10, %p2305_p13 }
  0xab   : > { %851 = vmatpush2.bf16.msra.mxu1 %v2010_v35  ;;  %1086 = vmatpush1.bf16.msra.mxu0 %v2035_v53  ;;  %v2080_v35 = vld [vmem:[#allocation10 + $0x70] ss:$8 sps:$4 sm:$0xff]   ;;  %v2109_v53 = vld [vmem:[#allocation10 + $0xe4] ss:$8 sps:$4 sm:$0xff]  }
  0xac   : > { %852 = vmatprep.subr.bf16.mxu1 %v2011_v36  ;;  %1087 = vmatprep.subr.bf16.mxu0 %v2040_v54  ;;  %v2082_v36 = vld [vmem:[#allocation10 + $0x74] ss:$8 sps:$4 sm:$0xff]   ;;  %v2107_v54 = vld [vmem:[#allocation10 + $0xe0] ss:$8 sps:$4 sm:$0xff]  }
  0xaf   : > { %853 = vmatpush2.bf16.msra.mxu1 %v2013_v37  ;;  %1088 = vmatpush1.bf16.msra.mxu0 %v2038_v55  ;;  %v2085_v37 = vld [vmem:[#allocation10 + $0x64] ss:$8 sps:$4 sm:$0xff]   ;;  %v2112_v55 = vld [vmem:[#allocation10 + $0xd4] ss:$8 sps:$4 sm:$0xff]  }
  0xb0   : > { %854 = vmatprep.subr.bf16.mxu1 %v2014_v38  ;;  %1089 = vmatprep.subr.bf16.mxu0 %v2043_v56  ;;  %v2083_v38 = vld [vmem:[#allocation10 + $0x60] ss:$8 sps:$4 sm:$0xff]   ;;  %v2110_v56 = vld [vmem:[#allocation10 + $0xd0] ss:$8 sps:$4 sm:$0xff]  }
  0xb3   : > { %855 = vmatpush2.bf16.msra.mxu1 %v2016_v39  ;;  %1090 = vmatpush1.bf16.msra.mxu0 %v2041_v57  ;;  %v2088_v39 = vld [vmem:[#allocation10 + $0x54] ss:$8 sps:$4 sm:$0xff]   ;;  %v2115_v57 = vld [vmem:[#allocation10 + $0xc4] ss:$8 sps:$4 sm:$0xff]  }
  0xb4   : > { %856 = vmatprep.subr.bf16.mxu1 %v2017_v40  ;;  %1091 = vmatprep.subr.bf16.mxu0 %v2046_v58  ;;  %v2086_v40 = vld [vmem:[#allocation10 + $0x50] ss:$8 sps:$4 sm:$0xff]   ;;  %v2113_v58 = vld [vmem:[#allocation10 + $0xc0] ss:$8 sps:$4 sm:$0xff]  }
  0xb7   : > { %857 = vmatpush2.bf16.msra.mxu1 %v2019_v41  ;;  %1092 = vmatpush1.bf16.msra.mxu0 %v2044_v59  ;;  %v2091_v41 = vld [vmem:[#allocation10 + $0x44] ss:$8 sps:$4 sm:$0xff]   ;;  %v2118_v59 = vld [vmem:[#allocation10 + $0xb4] ss:$8 sps:$4 sm:$0xff]  }
  0xb8   : > { %858 = vmatprep.subr.bf16.mxu1 %v2020_v42  ;;  %1093 = vmatprep.subr.bf16.mxu0 %v2049_v60  ;;  %v2089_v42 = vld [vmem:[#allocation10 + $0x40] ss:$8 sps:$4 sm:$0xff]   ;;  %v2116_v60 = vld [vmem:[#allocation10 + $0xb0] ss:$8 sps:$4 sm:$0xff]  }
  0xbb   : > { %859 = vmatpush2.bf16.msra.mxu1 %v2022_v43  ;;  %1094 = vmatpush1.bf16.msra.mxu0 %v2047_v61  ;;  %v2094_v43 = vld [vmem:[#allocation10 + $0x34] ss:$8 sps:$4 sm:$0xff]   ;;  %v2121_v61 = vld [vmem:[#allocation10 + $0xa4] ss:$8 sps:$4 sm:$0xff]  }
  0xbc   : > { %860 = vmatprep.subr.bf16.mxu1 %v2023_v44  ;;  %1095 = vmatprep.subr.bf16.mxu0 %v2052_v62  ;;  %v2092_v44 = vld [vmem:[#allocation10 + $0x30] ss:$8 sps:$4 sm:$0xff]   ;;  %v2119_v62 = vld [vmem:[#allocation10 + $0xa0] ss:$8 sps:$4 sm:$0xff]  }
  0xbf   : > { %861 = vmatpush2.bf16.msra.mxu1 %v2025_v45  ;;  %1096 = vmatpush1.bf16.msra.mxu0 %v2050_v63  ;;  %v2097_v45 = vld [vmem:[#allocation10 + $0x24] ss:$8 sps:$4 sm:$0xff]   ;;  %v662_v63 = vld [vmem:[%s2713_s4] sm:$0x3] }
  0xc0   : > { %862 = vmatprep.subr.bf16.mxu1 %v2026_v46  ;;  %1097 = vmatprep.subr.bf16.mxu0 %v2055_v0  ;;  %v2095_v46 = vld [vmem:[#allocation10 + $0x20] ss:$8 sps:$4 sm:$0xff]   ;;  %v667_v0 = vrot.slane %v662_v63, %v2640_v16 }
  0xc3   : > { %863 = vmatpush2.bf16.msra.mxu1 %v2028_v47  ;;  %1098 = vmatpush1.bf16.msra.mxu0 %v2053_v1  ;;  %v2100_v47 = vld [vmem:[#allocation10 + $0x14] ss:$8 sps:$4 sm:$0xff]   ;;  %v671_v1 = vrot.slane %v662_v63, %v2645_v18 }
  0xc4   : > { %864 = vmatprep.subr.bf16.mxu1 %v2029_v48  ;;  %1099 = vmatprep.subr.bf16.mxu0 %v2058_v2  ;;  %v2098_v48 = vld [vmem:[#allocation10 + $0x10] ss:$8 sps:$4 sm:$0xff]  }
  0xc7   : > { %865 = vmatpush2.bf16.msra.mxu1 %v2031_v49  ;;  %1100 = vmatpush2.bf16.msra.mxu0 %v2056_v3  ;;  %v2103_v49 = vld [vmem:[#allocation10 + $0x4] ss:$8 sps:$4 sm:$0xff]  }
  0xc8   : > { %1101 = vmatprep.subr.bf16.mxu0 %v2061_v4  ;;  %1332 = vmatprep.subr.bf16.mxu1 %v2082_v36 }
  0xcb   : > { %1102 = vmatpush2.bf16.msra.mxu0 %v2059_v5 }
  0xcc   : > { %1103 = vmatprep.subr.bf16.mxu0 %v2064_v6 }
  0xcf   : > { %1104 = vmatpush2.bf16.msra.mxu0 %v2062_v7 }
  0xd0   : > { %1105 = vmatprep.subr.bf16.mxu0 %v2067_v8 }
  0xd3   : > { %1106 = vmatpush2.bf16.msra.mxu0 %v2065_v9 }
  0xd4   : > { %1107 = vmatprep.subr.bf16.mxu0 %v2070_v10 }
  0xd7   : > { %1108 = vmatpush2.bf16.msra.mxu0 %v2068_v11 }
  0xd8   : > { %1109 = vmatprep.subr.bf16.mxu0 %v2073_v12  ;;  %v2124_v12 = vld [vmem:[#allocation10 + $0x94] ss:$8 sps:$4 sm:$0xff]  }
  0xdb   : > { %1110 = vmatpush2.bf16.msra.mxu0 %v2071_v13  ;;  %v2122_v13 = vld [vmem:[#allocation10 + $0x90] ss:$8 sps:$4 sm:$0xff]  }
  0xdc   : > { %1111 = vmatprep.subr.bf16.mxu0 %v2076_v31 }
  0xdf   : > { %1112 = vmatpush2.bf16.msra.mxu0 %v2074_v32 }
  0xe0   : > { %1113 = vmatprep.subr.bf16.mxu0 %v2079_v33 }
  0xe3   : > { %1114 = vmatpush2.bf16.msra.mxu0 %v2077_v34 }
  0xe4   : > { %1836 = vmatprep.subr.bf16.mxu0 %v2128_v17 }
 0x166   : > { %v619_v21 = vpop.f32.mrf.mxu0 }
 0x167   : > { %v620_v22 = vadd.f32 %v619_v21, %v498_v19  ;;  %v2129_v19 = vld [vmem:[#allocation11 + $0x38] sm:$0xff]   ;;  %v2131_v21 = vld [vmem:[#allocation11 + $0x30] sm:$0xff]  }
 0x168   : > { %v621_v23 = vpop.f32.mrf.mxu0 }
 0x169   : > { %v622_v24 = vadd.f32 %v621_v23, %v502_v20  ;;  %v626_v25 = vmax.f32 %v620_v22, 0.0  ;;  %v2130_v20 = vld [vmem:[#allocation11 + $0x70] sm:$0xff]   ;;  %v2132_v22 = vld [vmem:[#allocation11 + $0x68] sm:$0xff]  }
 0x16a   : > { %v623_v26 = vpop.f32.mrf.mxu0  ;;  %v2133_v23 = vld [vmem:[#allocation11 + $0x28] sm:$0xff]  }
 0x16b   : > { %v627_v27 = vmax.f32 %v622_v24, 0.0  ;;  %v628_v30 = vpack.c.bf16 %v626_v25, %v626_v25  ;;  %v2134_v24 = vld [vmem:[#allocation11 + $0x60] sm:$0xff]   ;;  %v2136_v26 = vld [vmem:[#allocation11 + $0x58] sm:$0xff]  }
 0x16c   : > { %v624_v28 = vpop.f32.mrf.mxu0  ;;  %v2135_v25 = vld [vmem:[#allocation11 + $0x20] sm:$0xff]  }
 0x16d   : > { %v629_v29 = vpack.c.bf16 %v627_v27, %v627_v27  ;;  %v2137_v27 = vld [vmem:[#allocation11 + $0x18] sm:$0xff]   ;;  %v2138_v28 = vld [vmem:[#allocation11 + $0x50] sm:$0xff]  }
 0x16f   : > { %866 = vmatprep.mubr.bf16.mxu1 %v629_v29  ;;  %v2139_v29 = vld [vmem:[#allocation11 + $0x10] sm:$0xff]  }
 0x170   : > { %867 = vmatmul.mubr.bf16.vlgmr.msra.gmra.mxu1 %v628_v30  ;;  %v911_v30 = vld [vmem:[%s2715_s6] sm:$0x3] }
 0x171   : > { %1333 = vmatpush1.bf16.msra.mxu1 %v2080_v35  ;;  %v916_v31 = vrot.slane %v911_v30, %v2640_v16  ;;  %v920_v32 = vrot.slane %v911_v30, %v2645_v18 }
 0x172   : > { %1334 = vmatprep.subr.bf16.mxu1 %v2085_v37 }
 0x175   : > { %1335 = vmatpush1.bf16.msra.mxu1 %v2083_v38 }
 0x176   : > { %1336 = vmatprep.subr.bf16.mxu1 %v2088_v39 }
 0x179   : > { %1337 = vmatpush1.bf16.msra.mxu1 %v2086_v40 }
 0x17a   : > { %1338 = vmatprep.subr.bf16.mxu1 %v2091_v41 }
 0x17d   : > { %1339 = vmatpush1.bf16.msra.mxu1 %v2089_v42 }
 0x17e   : > { %1340 = vmatprep.subr.bf16.mxu1 %v2094_v43  ;;  %v2140_v43 = vld [vmem:[#allocation11 + $0x48] sm:$0xff]  }
 0x181   : > { %1341 = vmatpush1.bf16.msra.mxu1 %v2092_v44  ;;  %v2141_v44 = vld [vmem:[#allocation11 + $0x8] sm:$0xff]  }
 0x182   : > { %1342 = vmatprep.subr.bf16.mxu1 %v2097_v45  ;;  %v2142_v45 = vld [vmem:[#allocation11 + $0x40] sm:$0xff]  }
 0x185   : > { %1343 = vmatpush1.bf16.msra.mxu1 %v2095_v46  ;;  %v2143_v46 = vld [vmem:[#allocation11] sm:$0xff]  }
 0x186   : > { %1344 = vmatprep.subr.bf16.mxu1 %v2100_v47  ;;  %v1160_v47 = vld [vmem:[%s2717_s8] sm:$0x3] }
 0x189   : > { %1345 = vmatpush1.bf16.msra.mxu1 %v2098_v48  ;;  %v1165_v48 = vrot.slane %v1160_v47, %v2640_v16  ;;  %v1815_v16 = vld [vmem:[%s2719_s10] ss:$0 sm:$0xff] }
 0x18a   : > { %1346 = vmatprep.subr.bf16.mxu1 %v2103_v49  ;;  %v1169_v49 = vrot.slane %v1160_v47, %v2645_v18 }
 0x18d   : > { %1347 = vmatpush1.bf16.msra.mxu1 %v2101_v50 }
 0x18e   : > { %1348 = vmatprep.subr.bf16.mxu1 %v2106_v51 }
 0x191   : > { %1349 = vmatpush2.bf16.msra.mxu1 %v2104_v52 }
 0x192   : > { %1350 = vmatprep.subr.bf16.mxu1 %v2109_v53 }
 0x195   : > { %1351 = vmatpush2.bf16.msra.mxu1 %v2107_v54 }
 0x196   : > { %1352 = vmatprep.subr.bf16.mxu1 %v2112_v55 }
 0x199   : > { %1353 = vmatpush2.bf16.msra.mxu1 %v2110_v56 }
 0x19a   : > { %1354 = vmatprep.subr.bf16.mxu1 %v2115_v57 }
 0x19d   : > { %1355 = vmatpush2.bf16.msra.mxu1 %v2113_v58 }
 0x19e   : > { %1356 = vmatprep.subr.bf16.mxu1 %v2118_v59 }
 0x1a1   : > { %1357 = vmatpush2.bf16.msra.mxu1 %v2116_v60 }
 0x1a2   : > { %1358 = vmatprep.subr.bf16.mxu1 %v2121_v61 }
 0x1a5   : > { %1359 = vmatpush2.bf16.msra.mxu1 %v2119_v62 }
 0x1a6   : > { %1360 = vmatprep.subr.bf16.mxu1 %v2124_v12 }
 0x1a9   : > { %1361 = vmatpush2.bf16.msra.mxu1 %v2122_v13 }
 0x1aa   : > { %1362 = vmatprep.subr.bf16.mxu1 %v2127_v14 }
 0x1ad   : > { %1363 = vmatpush2.bf16.msra.mxu1 %v2125_v15 }
 0x230   : > { %v868_v2 = vpop.f32.mrf.mxu1 }
 0x231   : > { %v869_v3 = vadd.f32 %v868_v2, %v667_v0 }
 0x232   : > { %v870_v4 = vpop.f32.mrf.mxu1 }
 0x233   : > { %v871_v5 = vadd.f32 %v870_v4, %v671_v1  ;;  %v875_v6 = vmax.f32 %v869_v3, 0.0 }
 0x234   : > { %v872_v7 = vpop.f32.mrf.mxu1 }
 0x235   : > { %v876_v8 = vmax.f32 %v871_v5, 0.0  ;;  %v877_v11 = vpack.c.bf16 %v875_v6, %v875_v6 }
 0x236   : > { %v873_v9 = vpop.f32.mrf.mxu1 }
 0x237   : > { %v878_v10 = vpack.c.bf16 %v876_v8, %v876_v8 }
 0x239   : > { %1115 = vmatprep.mubr.bf16.mxu0 %v878_v10 }
 0x23a   : > { %1116 = vmatmul.mubr.bf16.vlgmr.msra.gmra.mxu0 %v877_v11 }
 0x23b   : > { %1837 = vmatpush3.bf16.msra.mxu0 %v2129_v19 }
 0x23c   : > { %1838 = vmatprep.subr.bf16.mxu0 %v2130_v20 }
 0x23f   : > { %1839 = vmatpush3.bf16.msra.mxu0 %v2131_v21 }
 0x240   : > { %1840 = vmatprep.subr.bf16.mxu0 %v2132_v22 }
 0x243   : > { %1841 = vmatpush3.bf16.msra.mxu0 %v2133_v23 }
 0x244   : > { %1842 = vmatprep.subr.bf16.mxu0 %v2134_v24 }
 0x247   : > { %1843 = vmatpush3.bf16.msra.mxu0 %v2135_v25 }
 0x248   : > { %1844 = vmatprep.subr.bf16.mxu0 %v2136_v26 }
 0x24b   : > { %1845 = vmatpush3.bf16.msra.mxu0 %v2137_v27 }
 0x24c   : > { %1846 = vmatprep.subr.bf16.mxu0 %v2138_v28 }
 0x24f   : > { %1847 = vmatpush3.bf16.msra.mxu0 %v2139_v29 }
 0x250   : > { %1848 = vmatprep.subr.bf16.mxu0 %v2140_v43 }
 0x253   : > { %1849 = vmatpush3.bf16.msra.mxu0 %v2141_v44 }
 0x254   : > { %1850 = vmatprep.subr.bf16.mxu0 %v2142_v45 }
 0x257   : > { %1851 = vmatpush3.bf16.msra.mxu0 %v2143_v46 }
 0x2fa   : > { %v1117_v33 = vpop.f32.mrf.mxu0 }
 0x2fb   : > { %v1118_v34 = vadd.f32 %v1117_v33, %v916_v31 }
 0x2fc   : > { %v1119_v35 = vpop.f32.mrf.mxu0 }
 0x2fd   : > { %v1120_v36 = vadd.f32 %v1119_v35, %v920_v32  ;;  %v1124_v37 = vmax.f32 %v1118_v34, 0.0 }
 0x2fe   : > { %v1121_v38 = vpop.f32.mrf.mxu0 }
 0x2ff   : > { %v1125_v39 = vmax.f32 %v1120_v36, 0.0  ;;  %v1126_v42 = vpack.c.bf16 %v1124_v37, %v1124_v37 }
 0x300   : > { %v1122_v40 = vpop.f32.mrf.mxu0 }
 0x301   : > { %v1127_v41 = vpack.c.bf16 %v1125_v39, %v1125_v39 }
 0x303   : > { %1364 = vmatprep.mubr.bf16.mxu1 %v1127_v41 }
 0x304   : > { %1365 = vmatmul.mubr.bf16.vlgmr.msra.gmra.mxu1 %v1126_v42 }
 0x3c4   : > { %v1366_v50 = vpop.f32.mrf.mxu1 }
 0x3c5   : > { %v1367_v51 = vadd.f32 %v1366_v50, %v1165_v48 }
 0x3c6   : > { %v1368_v52 = vpop.f32.mrf.mxu1 }
 0x3c7   : > { %v1369_v53 = vadd.f32 %v1368_v52, %v1169_v49  ;;  %v1373_v54 = vmax.f32 %v1367_v51, 0.0 }
 0x3c8   : > { %v1370_v55 = vpop.f32.mrf.mxu1 }
 0x3c9   : > { %v1374_v56 = vmax.f32 %v1369_v53, 0.0  ;;  %v1375_v59 = vpack.c.bf16 %v1373_v54, %v1373_v54 }
 0x3ca   : > { %v1371_v57 = vpop.f32.mrf.mxu1 }
 0x3cb   : > { %v1376_v58 = vpack.c.bf16 %v1374_v56, %v1374_v56 }
 0x3cd   : > { %1544 = vmatprep.mubr.bf16.mxu0 %v1376_v58 }
 0x3ce   : > { %1545 = vmatmul.mubr.bf16.vlgmr.msra.gmra.mxu0 %v1375_v59 }
 0x48e   : > { %v1852_v60 = vpop.f32.mrf.mxu0 }
 0x490   : > { %v1853_v18 = vpop.f32.mrf.mxu0 }
 0x491   : > { %v1854_v61 = vadd.f32 %v1853_v18, %v1852_v60 }
 0x492   : > { %v1855_v62 = vpop.f32.mrf.mxu0 }
 0x493   : > { %v1547_v63 = vadd.f32 %v1854_v61, %v1815_v16 }
 0x494   : > { %v1856_v0 = vpop.f32.mrf.mxu0 }
 0x495   : > { %1552 = vst [vmem:[%s474_s7] sm:$0xff] %v1547_v63 }
 0x496   : > { %2315 = shalt.err (!%p2312_p1)
}
 0x497   : > { %s2316_s26 = scalar_lea.hbm %s2672_s3, 128  ;;  %s2320_s14 = scalar_lea.hbm %s2720_s11, 256 }
 0x498   : > { %p2317_p3 = scmp.ne.s32.totalorder %s2672_s3, %s2316_s26  ;;  %p2321_p6 = scmp.lt.s32.totalorder %s2672_s3, %s2720_s11 }
 0x499   : > { %p2322_p2 = scmp.lt.s32.totalorder %s2320_s14, %s2316_s26 }
 0x49a   : > { %p2318_p4 = pnand %p2317_p3, %p2751_p11 }
 0x49b   : > { %p2323_p7 = por %p2322_p2, %p2321_p6 }
 0x49c   : > { %p2319_p12 = pneg %p2318_p4 }
 0x49e   : > { %p2324_p8 = pnand %p2323_p7, %p2319_p12 }
 0x4a0   : > { %2327 = shalt.err (!%p2324_p8)
}
 0x4a1   : > { %1880 = dma.vmem_to_hbm [thread:$0]  (%p2751_p11), %s1568_s30, 128, %s2672_s3, %s1554_s24  }
 0x4a2 PF: > { %s1579_s22 = sand.u32 1, %s2366_s17   ;;  %p2752_p0 = scmp.ne.s32.totalorder %s2741_s12, 0 }
 0x4a3   : > { %p2753_p13 = scmp.ge.s32.totalorder %s2378_s20, 2  ;;  %s1580_s7 = scalar_lea.sflag [#allocation4], %s1579_s22 }
 0x4a5   : > { %p1903_p5 = pnand %p2753_p13, %p2752_p0 }
 0x4a7   : > { %p1904_p9 = pneg %p1903_p5 }
 0x4a9   : > { %2361 = dma.done.wait (%p1904_p9), %s1580_s7, 128  }
 0x4aa   : > { %2363 = vsyncadd (%p1904_p9), %s1580_s7, 4294967168  ;;  %s2754_s9 = sld [smem:[#allocation19_spill]]  ;;  %p27_p10 = scmp.ge.s32.totalorder %s2560_s16, 4  }
 0x4ab   : > { %s2755_s17 = smov %s2370_s18  ;;  %s2756_s18 = smov %s2374_s19 }
 0x4ac   : > { %s2758_s20 = smov %s2560_s16  ;;  %29 = sbr.rel (!%p27_p10) target bundleno = 14 (0xe), region = 129 }
 0x4b0   : > { %s2757_s19 = smov %s2754_s9 }
 0x4b1   :  { %1585 = vsyncpa [#allocation3], 1 }
 0x4b2   :  { %1587 = vsyncpa [#allocation3 + $0x1], 1 }
 0x4b3   :  { %1588 = vsyncpa [#allocation6], 1 }
 0x4b4   :  { %1589 = vsyncpa [#allocation9], 1 }
 0x4b5   :  { %1590 = vsyncpa [#allocation12], 1 }
 0x4b6   :  { %1591 = vsyncpa [#allocation4], 1 }
 0x4b7   :  { %1593 = vsyncpa [#allocation4 + $0x1], 1 }

</bundles_post_ra>
